<compile_context>
chip_gen: v5e
topology: v5e:2x2
jax: 0.10.0
libtpu: 0.0.40
codegen_flags: <defaults>
</compile_context>

<pallas_src>
import functools

import jax
import jax.numpy as jnp
from jax import lax
from jax.experimental import pallas as pl
from jax.experimental.pallas import tpu as pltpu


_NEG_INIT = -1e30   # finite "minus infinity" for the online-softmax max state
_MASK_VAL = -1e9    # matches the reference masked_fill value


def _scoped_vmem_limit():
    """Raise scoped VMEM above the 32 MiB default, staying below physical."""
    try:
        cap = pltpu.get_tpu_info().vmem_capacity_bytes
    except Exception:
        cap = 128 * 1024 * 1024
    return int(min(64 * 1024 * 1024, (cap * 3) // 4))


# --------------------------------------------------------------------------
# Kernel 1: fused lane-dense QKV projection  (B, S, dim_inp) -> (B, S, 3*HD)
# --------------------------------------------------------------------------
def _qkv_proj_kernel(x_ref, wqkv_ref, bqkv_ref, qkv_ref):
    x = x_ref[0].astype(jnp.bfloat16)                       # (ts, dim_inp)
    qkv = jnp.dot(x, wqkv_ref[...],
                  preferred_element_type=jnp.float32)       # (ts, 3*HD) f32
    qkv_ref[0] = (qkv + bqkv_ref[...]).astype(jnp.bfloat16)


# --------------------------------------------------------------------------
# Kernel 2: flash-style attention + head-accumulated output projection + LN
# grid = (B, n_q, H, n_k);  q/k/v are head-major (B, H, S, d) bf16.
# --------------------------------------------------------------------------
def _flash_mha_kernel(q_ref, k_ref, v_ref, mask_ref,
                      wl_ref, bl_ref, gamma_ref, beta_ref,
                      o_ref,
                      m_ref, l_ref, acc_ref, y_ref,
                      *, ln_eps):
    h = pl.program_id(2)
    ki = pl.program_id(3)
    last_h = pl.num_programs(2) - 1
    last_k = pl.num_programs(3) - 1

    # Output-projection accumulator: reset once per (batch, q-block).
    @pl.when(jnp.logical_and(h == 0, ki == 0))
    def _init_y():
        y_ref[...] = jnp.zeros(y_ref.shape, jnp.float32)

    # Online-softmax state: reset at the start of every head.
    @pl.when(ki == 0)
    def _init_flash():
        m_ref[...] = jnp.full(m_ref.shape, _NEG_INIT, jnp.float32)
        l_ref[...] = jnp.zeros(l_ref.shape, jnp.float32)
        acc_ref[...] = jnp.zeros(acc_ref.shape, jnp.float32)

    q = q_ref[0, 0]                                          # (tq, d) bf16, pre-scaled
    k = k_ref[0, 0]                                          # (tk, d) bf16
    v = v_ref[0, 0]                                          # (tk, d) bf16

    # q @ k^T contracting the last dims — no transpose materialized.
    s = lax.dot_general(q, k, (((1,), (1,)), ((), ())),
                        preferred_element_type=jnp.float32)  # (tq, tk) f32
    # int8 mask compared directly (no f32 conversion pass); nonzero = masked.
    s = jnp.where(mask_ref[0] != 0, jnp.float32(_MASK_VAL), s)

    m_prev = m_ref[...]
    m_new = jnp.maximum(m_prev, jnp.max(s, axis=-1, keepdims=True))
    alpha = jnp.exp(m_prev - m_new)
    p = jnp.exp(s - m_new)
    l_ref[...] = alpha * l_ref[...] + jnp.sum(p, axis=-1, keepdims=True)
    acc_ref[...] = alpha * acc_ref[...] + jnp.dot(
        p.astype(jnp.bfloat16), v, preferred_element_type=jnp.float32)
    m_ref[...] = m_new

    # End of this head's key loop: finish softmax exactly and fold the head's
    # context into the output projection (wl pre-reshaped to (H, d, dim_inp)),
    # replacing the masked column-stores into an (S, HD) slab.
    @pl.when(ki == last_k)
    def _finish_head():
        ctx = acc_ref[...] / l_ref[...]                      # exact divide
        y_ref[...] += jnp.dot(ctx.astype(jnp.bfloat16), wl_ref[0],
                              preferred_element_type=jnp.float32)

        # Last head: bias + two-pass LayerNorm, single full-tile store.
        @pl.when(h == last_h)
        def _finish_row():
            y = y_ref[...] + bl_ref[...]
            mean = jnp.mean(y, axis=-1, keepdims=True)
            yc = y - mean
            var = jnp.mean(yc * yc, axis=-1, keepdims=True)
            y_norm = yc * lax.rsqrt(var + jnp.float32(ln_eps))
            o_ref[0] = y_norm * gamma_ref[...] + beta_ref[...]


# --------------------------------------------------------------------------
# Wrapper
# --------------------------------------------------------------------------
def multi_head_attention(x, mask, params, *, num_heads, dim_inp, dim_out,
                         ln_eps=1e-5):
    """x: (B, S, dim_inp) f32; mask: (B, S, S), nonzero/True = masked."""
    B, S, _ = x.shape
    H, d = num_heads, dim_out
    HD = H * d
    wq, bq, wk, bk, wv, bv, wl, bl, gamma, beta = params

    vmem_limit = _scoped_vmem_limit()

    # --- one-time wrapper-side constant folding / layout plumbing ---
    # NOTE: the reference scales scores by sqrt(query.size(1)) == sqrt(S)
    # (the sequence length, not d_k); reproduced exactly, folded into Q.
    inv_scale = 1.0 / (float(S) ** 0.5)

    def fuse(w):  # (H, dim_inp, d) -> (dim_inp, H*d), head-major columns
        return jnp.transpose(w, (1, 0, 2)).reshape(dim_inp, HD)

    wqkv = jnp.concatenate([fuse(wq * inv_scale), fuse(wk), fuse(wv)],
                           axis=1).astype(jnp.bfloat16)               # (dim_inp, 3*HD)
    bqkv = jnp.concatenate([(bq * inv_scale).reshape(-1),
                            bk.reshape(-1), bv.reshape(-1)]
                           ).reshape(1, 3 * HD).astype(jnp.float32)   # (1, 3*HD)
    wl_h = wl.reshape(H, d, dim_inp).astype(jnp.bfloat16)             # (H, d, dim_inp)
    mask_i8 = (mask != 0).astype(jnp.int8)

    # --- kernel 1: fused QKV projection ---
    ts = S if S <= 256 else 256
    assert S % ts == 0
    qkv = pl.pallas_call(
        _qkv_proj_kernel,
        out_shape=jax.ShapeDtypeStruct((B, S, 3 * HD), jnp.bfloat16),
        grid_spec=pltpu.PrefetchScalarGridSpec(
            num_scalar_prefetch=0,
            grid=(B, S // ts),
            in_specs=[
                pl.BlockSpec((1, ts, dim_inp), lambda b, si: (b, si, 0)),
                pl.BlockSpec((dim_inp, 3 * HD), lambda b, si: (0, 0)),
                pl.BlockSpec((1, 3 * HD), lambda b, si: (0, 0)),
            ],
            out_specs=pl.BlockSpec((1, ts, 3 * HD), lambda b, si: (b, si, 0)),
        ),
        compiler_params=pltpu.CompilerParams(
            dimension_semantics=("parallel", "parallel"),
            vmem_limit_bytes=vmem_limit),
        cost_estimate=pl.CostEstimate(
            flops=2 * B * S * dim_inp * 3 * HD,
            transcendentals=0,
            bytes_accessed=(B * S * dim_inp * 4 + dim_inp * 3 * HD * 2
                            + B * S * 3 * HD * 2)),
    )(x, wqkv, bqkv)

    # Head-major relayout (pure XLA layout plumbing): q/k/v -> (B, H, S, d)
    qkv = qkv.reshape(B, S, 3, H, d)
    q = jnp.transpose(qkv[:, :, 0], (0, 2, 1, 3))
    k = jnp.transpose(qkv[:, :, 1], (0, 2, 1, 3))
    v = jnp.transpose(qkv[:, :, 2], (0, 2, 1, 3))

    # --- kernel 2: flash attention + output projection + LayerNorm ---
    tq = S if S <= 128 else 128
    tk = S if S <= 128 else 128
    assert S % tq == 0 and S % tk == 0
    n_q, n_k = S // tq, S // tk

    cost = pl.CostEstimate(
        flops=4 * B * H * S * S * d + 2 * B * S * HD * dim_inp,
        transcendentals=B * H * S * S,
        bytes_accessed=(3 * B * H * S * d * 2 + B * S * S
                        + HD * dim_inp * 2 + 3 * dim_inp * 4
                        + B * S * dim_inp * 4))

    out = pl.pallas_call(
        functools.partial(_flash_mha_kernel, ln_eps=ln_eps),
        out_shape=jax.ShapeDtypeStruct((B, S, dim_inp), jnp.float32),
        grid_spec=pltpu.PrefetchScalarGridSpec(
            num_scalar_prefetch=0,
            grid=(B, n_q, H, n_k),
            in_specs=[
                pl.BlockSpec((1, 1, tq, d), lambda b, qi, h, ki: (b, h, qi, 0)),  # q
                pl.BlockSpec((1, 1, tk, d), lambda b, qi, h, ki: (b, h, ki, 0)),  # k
                pl.BlockSpec((1, 1, tk, d), lambda b, qi, h, ki: (b, h, ki, 0)),  # v
                pl.BlockSpec((1, tq, tk), lambda b, qi, h, ki: (b, qi, ki)),      # mask int8
                pl.BlockSpec((1, d, dim_inp), lambda b, qi, h, ki: (h, 0, 0)),    # wl per head
                pl.BlockSpec((1, dim_inp), lambda b, qi, h, ki: (0, 0)),          # bl
                pl.BlockSpec((1, dim_inp), lambda b, qi, h, ki: (0, 0)),          # gamma
                pl.BlockSpec((1, dim_inp), lambda b, qi, h, ki: (0, 0)),          # beta
            ],
            out_specs=pl.BlockSpec((1, tq, dim_inp),
                                   lambda b, qi, h, ki: (b, qi, 0)),
            scratch_shapes=[
                pltpu.VMEM((tq, 1), jnp.float32),        # m (online-softmax max)
                pltpu.VMEM((tq, 1), jnp.float32),        # l (online-softmax denom)
                pltpu.VMEM((tq, d), jnp.float32),        # acc (per-head context)
                pltpu.VMEM((tq, dim_inp), jnp.float32),  # y  (output-proj accumulator)
            ],
        ),
        compiler_params=pltpu.CompilerParams(
            dimension_semantics=("parallel", "parallel", "arbitrary", "arbitrary"),
            vmem_limit_bytes=vmem_limit),
        cost_estimate=cost,
    )(q, k, v, mask_i8, wl_h, bl, gamma, beta)

    return out


# --------------------------------------------------------------------------
# Pure-JAX f32 reference mirroring the PyTorch module semantics.
# --------------------------------------------------------------------------
def reference_mha(x, mask, params, *, num_heads, ln_eps=1e-5):
    wq, bq, wk, bk, wv, bv, wl, bl, gamma, beta = params
    S = x.shape[1]
    scale = jnp.float32(S) ** 0.5
    ctxs = []
    for h in range(num_heads):
        q = x @ wq[h] + bq[h]
        k = x @ wk[h] + bk[h]
        v = x @ wv[h] + bv[h]
        scores = jnp.einsum('bqd,bkd->bqk', q, k) / scale
        scores = jnp.where(mask != 0, -1e9, scores)
        attn = jax.nn.softmax(scores, axis=-1)
        ctxs.append(jnp.einsum('bqk,bkd->bqd', attn, v))
    cat = jnp.concatenate(ctxs, axis=-1)
    y = cat @ wl + bl[0]
    mean = jnp.mean(y, axis=-1, keepdims=True)
    var = jnp.mean((y - mean) ** 2, axis=-1, keepdims=True)
    return (y - mean) / jnp.sqrt(var + ln_eps) * gamma[0] + beta[0]


if __name__ == "__main__":
    B, S = 2, 8
    num_heads, dim_inp, dim_out = 4, 32, 16

    key = jax.random.PRNGKey(0)
    keys = jax.random.split(key, 10)

    x = jax.random.normal(keys[0], (B, S, dim_inp), dtype=jnp.float32)
    mask_bool = jax.random.bernoulli(keys[1], p=0.2, shape=(B, S, S))

    def init_w(k, shape, fan_in):
        bound = 1.0 / (fan_in ** 0.5)
        return jax.random.uniform(k, shape, jnp.float32, -bound, bound)

    wq = init_w(keys[2], (num_heads, dim_inp, dim_out), dim_inp)
    bq = init_w(keys[3], (num_heads, dim_out), dim_inp)
    wk = init_w(keys[4], (num_heads, dim_inp, dim_out), dim_inp)
    bk = init_w(keys[5], (num_heads, dim_out), dim_inp)
    wv = init_w(keys[6], (num_heads, dim_inp, dim_out), dim_inp)
    bv = init_w(keys[7], (num_heads, dim_out), dim_inp)
    wl = init_w(keys[8], (num_heads * dim_out, dim_inp), num_heads * dim_out)
    bl = init_w(keys[9], (1, dim_inp), num_heads * dim_out)
    gamma = jnp.ones((1, dim_inp), jnp.float32)
    beta = jnp.zeros((1, dim_inp), jnp.float32)

    params = (wq, bq, wk, bk, wv, bv, wl, bl, gamma, beta)

    out = multi_head_attention(x, mask_bool, params,
                               num_heads=num_heads,
                               dim_inp=dim_inp,
                               dim_out=dim_out)
    out = jax.block_until_ready(out)

    ref = reference_mha(x, mask_bool, params, num_heads=num_heads)
    assert out.shape == (B, S, dim_inp)
    # bf16 MXU inputs (f32 accumulation, exact softmax divide) — tolerance
    # reflects the bf16 cast of q/k/v/attn, not approximations.
    assert jnp.allclose(out, ref, atol=5e-2, rtol=5e-2), "mismatch vs JAX reference"

    print("KERNEL_OK")
</pallas_src>

<mosaic_0001>
module attributes {stable_mosaic.version = 11 : i64} {
  func.func @_qkv_proj_kernel(%arg0: i32, %arg1: i32, %arg2: memref<1x8x32xf32, #tpu.memory_space<vmem>>, %arg3: memref<32x192xbf16, #tpu.memory_space<vmem>>, %arg4: memref<1x192xf32, #tpu.memory_space<vmem>>, %arg5: memref<1x8x192xbf16, #tpu.memory_space<vmem>>) attributes {dimension_semantics = [#tpu.dimension_semantics<parallel>, #tpu.dimension_semantics<parallel>], iteration_bounds = array<i64: 2, 1>, scalar_prefetch = 0 : i64, scratch_operands = 0 : i64, tpu.core_type = #tpu.core_type<tc>, window_params = [{transform_indices = @transform_0, window_bounds = array<i64: 1, 8, 32>}, {pipeline_mode = #tpu.pipeline_mode<synchronous>, transform_indices = @transform_1, window_bounds = array<i64: 32, 192>}, {pipeline_mode = #tpu.pipeline_mode<synchronous>, transform_indices = @transform_2, window_bounds = array<i64: 1, 192>}, {transform_indices = @transform_3, window_bounds = array<i64: 1, 8, 192>}]} {
    %c0 = arith.constant 0 : index
    %c0_0 = arith.constant 0 : index
    %c0_1 = arith.constant 0 : index
    %0 = vector.load %arg2[%c0, %c0_0, %c0_1] : memref<1x8x32xf32, #tpu.memory_space<vmem>>, vector<1x8x32xf32>
    %1 = vector.shape_cast %0 : vector<1x8x32xf32> to vector<8x32xf32>
    %2 = arith.truncf %1 : vector<8x32xf32> to vector<8x32xbf16>
    %c0_2 = arith.constant 0 : index
    %c0_3 = arith.constant 0 : index
    %3 = vector.load %arg3[%c0_2, %c0_3] : memref<32x192xbf16, #tpu.memory_space<vmem>>, vector<32x192xbf16>
    %cst = arith.constant dense<0.000000e+00> : vector<8x192xf32>
    %4 = tpu.matmul %2, %3, %cst {dimension_numbers = #tpu.dot_dimension_numbers<[1], [0], [0], [1], [0, 0, 1, 1], [], []>} : vector<8x32xbf16>, vector<32x192xbf16>, vector<8x192xf32> -> vector<8x192xf32>
    %c0_4 = arith.constant 0 : index
    %c0_5 = arith.constant 0 : index
    %5 = vector.load %arg4[%c0_4, %c0_5] : memref<1x192xf32, #tpu.memory_space<vmem>>, vector<1x192xf32>
    %6 = vector.broadcast %5 : vector<1x192xf32> to vector<8x192xf32>
    %7 = arith.addf %4, %6 : vector<8x192xf32>
    %8 = arith.truncf %7 : vector<8x192xf32> to vector<8x192xbf16>
    %c0_6 = arith.constant 0 : index
    %c0_7 = arith.constant 0 : index
    %c0_8 = arith.constant 0 : index
    %9 = vector.load %arg5[%c0_6, %c0_7, %c0_8] : memref<1x8x192xbf16, #tpu.memory_space<vmem>>, vector<1x8x192xbf16>
    %10 = vector.shape_cast %9 : vector<1x8x192xbf16> to vector<8x192xbf16>
    %11 = vector.shape_cast %8 : vector<8x192xbf16> to vector<1x8x192xbf16>
    tpu.vector_store %arg5[%c0_6, %c0_7, %c0_8], %11 {strides = array<i32>} : memref<1x8x192xbf16, #tpu.memory_space<vmem>>, vector<1x8x192xbf16>,
    return
  }
  func.func @transform_0(%arg0: i32, %arg1: i32) -> (i32, i32, i32) {
    %c0_i32 = arith.constant 0 : i32
    %c0_i32_0 = arith.constant 0 : i32
    return %arg0, %arg1, %c0_i32 : i32, i32, i32
  }
  func.func @transform_1(%arg0: i32, %arg1: i32) -> (i32, i32) {
    %c0_i32 = arith.constant 0 : i32
    %c0_i32_0 = arith.constant 0 : i32
    %c0_i32_1 = arith.constant 0 : i32
    return %c0_i32, %c0_i32_0 : i32, i32
  }
  func.func @transform_2(%arg0: i32, %arg1: i32) -> (i32, i32) {
    %c0_i32 = arith.constant 0 : i32
    %c0_i32_0 = arith.constant 0 : i32
    %c0_i32_1 = arith.constant 0 : i32
    return %c0_i32, %c0_i32_0 : i32, i32
  }
  func.func @transform_3(%arg0: i32, %arg1: i32) -> (i32, i32, i32) {
    %c0_i32 = arith.constant 0 : i32
    %c0_i32_0 = arith.constant 0 : i32
    return %arg0, %arg1, %c0_i32 : i32, i32, i32
  }
}

</mosaic_0001>

<bundles_post_ra>
// kernel: tpu_custom_call.1
= control target key start
LH: loop header
LB: loop body
LE: loop exit
PB: predicated region body
PF: predicated region fallthrough
CT: control target
= control target key end

     0   :  { %8 = vsyncpa [#allocation3], 0  ;;  %s900_s0 = inlined_call_operand.hbm [shape: f32[2,8,32], index: 0, kind: input, shape index: {}]   ;;  %s901_s1 = inlined_call_operand.hbm [shape: bf16[32,192], index: 1, kind: input, shape index: {}]   ;;  %s902_s2 = inlined_call_operand.hbm [shape: f32[1,192], index: 2, kind: input, shape index: {}]   ;;  %s903_s3 = inlined_call_operand.hbm [shape: bf16[2,8,192], index: 3, kind: output, shape index: {}]  }
   0x1   :  { %10 = vsyncpa [#allocation3 + $0x1], 0 }
   0x2   :  { %11 = vsyncpa [#allocation6], 0 }
   0x3   :  { %12 = vsyncpa [#allocation4], 0 }
   0x4   :  { %14 = vsyncpa [#allocation4 + $0x1], 0  ;;  %s752_s12 = smov 0   ;;  %s754_s13 = smov 0  }
   0x5   :  { %s756_s14 = smov 0   ;;  %s758_s15 = smov 0  }
   0x6   :  { %s760_s16 = smov 0   ;;  %s762_s17 = smov 0  }
   0x7 LB: > { %s424_s18 = sadd.s32 4294967295, %s726_s17   ;;  %p426_p0 = scmp.ge.s32.totalorder %s726_s17, 1  ;;  %s726_s17 = sphi %s762_s17, %s20_s17   ;;  %s722_s16 = sphi %s760_s16, %s913_s16   ;;  %s718_s15 = sphi %s758_s15, %s912_s15   ;;  %s714_s14 = sphi %s756_s14, %s911_s14   ;;  %s710_s13 = sphi %s754_s13, %s910_s13   ;;  %s706_s12 = sphi %s752_s12, %s909_s12  }
   0x8   : > { %p786_p1 = scmp.eq.s32.totalorder %s424_s18, 0  ;;  %p135_p2 = scmp.lt.s32.totalorder %s726_s17, 3 }
   0x9   : > { %s146_s22 = sshll.u32 %s901_s1, 4  ;;  %s728_s24 = smov [#allocation5]   ;;  %s147_s22 = int_to_ptr.hbm [resolvable:$true] %s146_s22 }
   0xa   : > { %p794_p3 = pnand %p426_p0, %p135_p2  ;;  %s148_s25 = sshll.u32 %s728_s24, 4  ;;  %s149_s25 = int_to_ptr.vmem [resolvable:$true] %s148_s25 }
   0xb   : > { %p429_p6 = scmp.ge.s32.totalorder %s726_s17, 2  ;;  %s161_s28 = sshll.u32 %s902_s2, 4  ;;  %s162_s28 = int_to_ptr.hbm [resolvable:$true] %s161_s28 }
   0xc   : > { %p477_p4 = pneg %p794_p3  ;;  %s729_s29 = smov 128  }
   0xd   : > { %s730_s30 = smov 8   ;;  %s731_s4 = smov [#allocation7]  }
   0xe   : > { %p478_p5 = pnand %p477_p4, %p786_p1  ;;  %s163_s5 = sshll.u32 %s731_s4, 4  ;;  %s164_s5 = int_to_ptr.vmem [resolvable:$true] %s163_s5 }
   0xf   : > { %s32_s6 = sadd.s32 1, %s722_s16  ;;  %s425_s7 = sadd.s32 4294967294, %s726_s17  }
  0x10   : > { %480 = dma.hbm_to_vmem [thread:$0]  (!%p478_p5), %s147_s22, 512, %s149_s25, [#allocation6], %s729_s29, %s729_s29, %s730_s30  }
  0x11   : > { %483 = dma.hbm_to_vmem [thread:$0]  (!%p478_p5), %s162_s28, 32, %s164_s5, [#allocation6]  }
  0x12   : > { %p34_p7 = scmp.ge.s32.totalorder %s32_s6, 2  ;;  %s41_s8 = sadd.s32 1, %s714_s14 }
  0x13   : > { %p48_p8 = scmp.ne.s32.totalorder %s714_s14, %s710_s13  ;;  %p49_p9 = scmp.eq.s32.totalorder %s726_s17, 0 }
  0x14   : > { %s915_s6 = smov (%p34_p7, %s32_s6), 0  ;;  %p54_p10 = scmp.ne.s32.totalorder %s710_s13, %s706_s12 }
  0x15   : > { %s36_s9 = ssub.s32 %s722_s16, %s915_s6  ;;  %p122_p11 = scmp.eq.s32.totalorder %s424_s18, 1 }
  0x16   : > { %p39_p12 = scmp.eq.s32.totalorder %s36_s9, 0  ;;  %p822_p13 = por %p786_p1, %p54_p10 }
  0x17   : > { %p826_p0 = por %p122_p11, %p48_p8  ;;  %p128_p2 = scmp.eq.s32.totalorder %s425_s7, 1 }
  0x18   : > { %s831_s20 = scalar_select %p39_p12, %s714_s14, %s41_s8  }
  0x19   : > { %p50_p4 = por %p49_p9, %p48_p8  ;;  %p833_p5 = por %p128_p2, %p54_p10 }
  0x1a   : > { %s174_s22 = sand.u32 1, %s714_s14   ;;  %s431_s18 = sshll.u32 %s722_s16, 3 }
  0x1b   : > { %p494_p7 = scmp.lt.s32.totalorder %s726_s17, 2  ;;  %s430_s24 = sshll.u32 %s174_s22, 3 }
  0x1c   : > { %s183_s27 = scalar_lea.hbm %s900_s0, %s431_s18  ;;  %s178_s29 = scalar_lea.vmem [#allocation2], %s430_s24 }
  0x1d   : > { %s185_s28 = sshll.u32 %s183_s27, 4  ;;  %s187_s30 = sshll.u32 %s178_s29, 4  ;;  %s186_s28 = int_to_ptr.hbm [resolvable:$true] %s185_s28  ;;  %s188_s30 = int_to_ptr.vmem [resolvable:$true] %s187_s30 }
  0x1e   : > { %p485_p11 = pnand %p494_p7, %p50_p4  ;;  %s175_s4 = scalar_lea.sflag [#allocation3], %s174_s22 }
  0x1f   : > { %196 = sbr.rel (%p794_p3) target bundleno = 184 (0xb8), region = 32  ;;  %s846_s5 = sand.u32 (!%p794_p3), 1, %s710_s13  }
  0x20   : > { %487 = dma.hbm_to_vmem [thread:$0]  (!%p485_p11), %s186_s28, 128, %s188_s30, %s175_s4  }
  0x21   : > { %s433_s7 = sshll.u32 (!%p794_p3), %s846_s5, 3  ;;  %s199_s8 = scalar_lea.sflag (!%p794_p3), [#allocation3], %s846_s5 }
  0x22   : > { %s202_s9 = scalar_lea.vmem (!%p794_p3), [#allocation2], %s433_s7 }
  0x24   : > { %693 = dma.done.wait (%p822_p13), %s199_s8, 128  }
  0x25   : > { %695 = vsyncadd (%p822_p13), %s199_s8, 4294967168 }
  0x26   : > { %697 = dma.done.wait (%p786_p1), [#allocation6], 544  }
  0x27   : > { %699 = vsyncadd (%p786_p1), [#allocation6], 4294966752  ;;  %v447_v0 = vld [vmem:[#allocation5 + $0x10] sm:$0xf]  ;;  %v463_v1 = vld [vmem:[#allocation5 + $0x14] sm:$0xf0] }
  0x28   : > { %v462_v2 = vld [vmem:[#allocation5 + $0x14] sm:$0xf]  ;;  %v448_v3 = vor.u32 %v463_v1, %v447_v0  ;;  %v449_v4 = vld [vmem:[#allocation5 + $0x18] sm:$0xf0]  ;;  %v439_v5 = vld [vmem:[#allocation5] sm:$0xf] }
  0x29   : > { %v461_v6 = vld [vmem:[#allocation5 + $0x4] sm:$0xf0]  ;;  %v452_v7 = vor.u32 %v462_v2, %v449_v4  ;;  %v460_v8 = vld [vmem:[#allocation5 + $0x4] sm:$0xf]  ;;  %v441_v9 = vld [vmem:[#allocation5 + $0x8] sm:$0xf0] }
  0x2a   : > { %279 = vmatpush.bf16.msra.mxu0 %v448_v3  ;;  %v440_v10 = vor.u32 %v461_v6, %v439_v5  ;;  %v237_v11 = vld [vmem:[%s202_s9] sm:$0xff]  ;;  %v444_v12 = vor.u32 %v460_v8, %v441_v9  ;;  %vm269_vm0 = vcmask 261120   ;;  %v243_v14 = vld [vmem:[#allocation7] sm:$0x3]  ;;  %s464_s19 = sshll.u32 %s718_s15, 3  ;;  %vm300_vm1 = vcmask 1043456  }
  0x2b   : > { %292 = vmatpush.bf16.msra.mxu1 %v452_v7  ;;  %v238_v13 = vpack.c.bf16 %v237_v11, %v237_v11  ;;  %v245_v15 = vperm.slane %v243_v14, 0  ;;  %v246_v16 = vperm.slane %v243_v14, 1  ;;  %s318_s22 = scalar_lea.hbm %s903_s3, %s464_s19  ;;  %vm301_vm2 = vcmask 523268   ;;  %s235_s18 = scalar_lea.vmem [#allocation8], %s433_s7 }
  0x2c   : > { %s320_s24 = sshll.u32 %s235_s18, 4  ;;  %s322_s25 = sshll.u32 %s318_s22, 4  ;;  %vm302_vm3 = vmor %vm301_vm2, %vm300_vm1  ;;  %s321_s24 = int_to_ptr.vmem [resolvable:$true] %s320_s24  ;;  %s323_s25 = int_to_ptr.hbm [resolvable:$true] %s322_s25 }
  0x2d   : > { %s305_s15 = scalar_lea.sflag [#allocation4], %s846_s5  ;;  %s654_s26 = sshra.s32 %s323_s25, 4  ;;  %s655_s26 = int_to_ptr.hbm [resolvable:$true] %s654_s26 }
  0x2e   : > { %280 = vmatpush.bf16.msra.mxu0 %v440_v10  ;;  %s656_s27 = scalar_lea.hbm %s655_s26, 8  ;;  %s660_s30 = scalar_lea.hbm %s903_s3, 16 }
  0x2f   : > { %293 = vmatpush.bf16.msra.mxu1 %v444_v12  ;;  %p657_p1 = scmp.ne.s32.totalorder %s655_s26, %s656_s27  ;;  %p661_p9 = scmp.lt.s32.totalorder %s655_s26, %s903_s3 }
  0x30   : > { %p662_p10 = scmp.lt.s32.totalorder %s660_s30, %s656_s27 }
  0x31   : > { %453 = vmatmul.msk.bf16.vlgmr.msra.gmra.mxu0 %vm269_vm0, %v238_v13  ;;  %p658_p3 = pnand %p657_p1, %p826_p0 }
  0x32   : > { %454 = vmatmul.msk.bf16.vlgmr.msra.gmra.mxu1 %vm269_vm0, %v238_v13  ;;  %p663_p12 = por %p662_p10, %p661_p9 }
  0x33   : > { %p659_p8 = pneg %p658_p3 }
  0x35   : > { %p664_p13 = pnand %p663_p12, %p659_p8 }
  0xae   : > { %v282_v17 = vpop.f32.mrf.mxu0 }
  0xaf   : > { %v283_v18 = vadd.f32 %v282_v17, %v245_v15  ;;  %v295_v19 = vpop.f32.mrf.mxu1 }
  0xb0   : > { %v296_v20 = vadd.f32 %v295_v19, %v246_v16 }
  0xb2   : > { %v299_v21 = vpack.c.bf16 %v296_v20, %v283_v18 }
  0xb4   : > { %303 = vst.msk [vmem:[%s235_s18] sm:$0xff] %vm302_vm3, %v299_v21 }
  0xb5   : > { %667 = shalt.err (!%p664_p13)
}
  0xb6   : > { %475 = dma.vmem_to_hbm [thread:$0]  (%p826_p0), %s321_s24, 128, %s323_s25, %s305_s15   ;;  %v284_v22 = vpop.f32.mrf.mxu0 }
  0xb7   : > { %v297_v23 = vpop.f32.mrf.mxu1 }
  0xb8 PF: > { %s334_s5 = sand.u32 1, %s706_s12   ;;  %p489_p2 = pnand %p429_p6, %p833_p5 }
  0xb9   : > { %s335_s8 = scalar_lea.sflag [#allocation4], %s334_s5 }
  0xba   : > { %p490_p4 = pneg %p489_p2 }
  0xbc   : > { %701 = dma.done.wait (%p490_p4), %s335_s8, 128  }
  0xbd   : > { %703 = vsyncadd (%p490_p4), %s335_s8, 4294967168  ;;  %s20_s17 = sadd.s32 1, %s726_s17   ;;  %s909_s12 = smov %s710_s13 }
  0xbe   : > { %p17_p7 = scmp.ge.s32.totalorder %s20_s17, 4   ;;  %s910_s13 = smov %s714_s14 }
  0xbf   : > { %s911_s14 = smov %s831_s20  ;;  %s912_s15 = smov %s722_s16 }
  0xc0   : > { %s913_s16 = smov %s915_s6  ;;  %19 = sbr.rel (!%p17_p7) target bundleno = 7 (0x7), region = 85 }
  0xc5   :  { %341 = vsyncpa [#allocation3], 1 }
  0xc6   :  { %343 = vsyncpa [#allocation3 + $0x1], 1 }
  0xc7   :  { %344 = vsyncpa [#allocation6], 1 }
  0xc8   :  { %345 = vsyncpa [#allocation4], 1 }
  0xc9   :  { %347 = vsyncpa [#allocation4 + $0x1], 1 }

</bundles_post_ra>
